<compile_context>
chip_gen: v7x
topology: tpu7x:2x2x1
jax: 0.10.0
libtpu: 0.0.40
codegen_flags: <defaults>
</compile_context>

<pallas_src>
import functools

import jax
import jax.numpy as jnp
from jax.experimental import pallas as pl
from jax.experimental.pallas import tpu as pltpu

_LANE = 1024  # lane-dense last dim: large multiple of 128 -> unmasked vst's


def _device_kind() -> str:
    try:
        return jax.devices()[0].device_kind.lower()
    except Exception:  # pragma: no cover - defensive, e.g. no backend yet
        return ""


# v7x (~3.2 TB/s per TC): bigger tiles amortize the ~0.35 us per-step cost.
# v5e/v6e: 512-row (2 MiB f32) tiles already sit at the HBM-roofline knee.
_BLOCK_ROWS = 1024 if ("v7" in _device_kind() or "7x" in _device_kind()) else 512


# ---------------------------------------------------------------------------
# Path 1: direct HBM -> HBM DMA copy (no VMEM staging, no padding).
# ---------------------------------------------------------------------------
def _dma_copy_kernel(x_hbm, o_hbm, sem):
    cp = pltpu.make_async_copy(x_hbm, o_hbm, sem)
    cp.start()
    cp.wait()


@jax.jit
def _dma_identity_copy(x):
    nbytes = x.size * jnp.dtype(x.dtype).itemsize
    return pl.pallas_call(
        _dma_copy_kernel,
        out_shape=jax.ShapeDtypeStruct(x.shape, x.dtype),
        in_specs=[pl.BlockSpec(memory_space=pl.ANY)],
        out_specs=pl.BlockSpec(memory_space=pl.ANY),
        scratch_shapes=[pltpu.SemaphoreType.DMA],
        cost_estimate=pl.CostEstimate(
            flops=0, transcendentals=0, bytes_accessed=2 * nbytes
        ),
    )(x)


# ---------------------------------------------------------------------------
# Path 2: lane-dense tiled VMEM copy (only for already-aligned large slabs).
# ---------------------------------------------------------------------------
def _tiled_copy_kernel(x_ref, o_ref):
    o_ref[...] = x_ref[...]


@functools.partial(jax.jit, static_argnames=("block_rows",))
def _tiled_identity_copy(x, *, block_rows):
    rows = x.size // _LANE
    # Collapsing leading dims with the last dim unchanged is layout-free.
    x2d = x.reshape(rows, _LANE)
    itemsize = jnp.dtype(x.dtype).itemsize
    tile_bytes = block_rows * _LANE * itemsize
    # Double-buffered input + output tiles, plus headroom; never the full VMEM.
    vmem_limit = 4 * tile_bytes + (4 << 20)

    out2d = pl.pallas_call(
        _tiled_copy_kernel,
        out_shape=jax.ShapeDtypeStruct((rows, _LANE), x.dtype),
        grid=(rows // block_rows,),
        in_specs=[pl.BlockSpec((block_rows, _LANE), lambda i: (i, 0))],
        out_specs=pl.BlockSpec((block_rows, _LANE), lambda i: (i, 0)),
        compiler_params=pltpu.CompilerParams(
            dimension_semantics=("parallel",),  # shard tiles across v7x's 2 TCs
            vmem_limit_bytes=vmem_limit,
        ),
        cost_estimate=pl.CostEstimate(
            flops=0, transcendentals=0, bytes_accessed=2 * rows * _LANE * itemsize
        ),
    )(x2d)
    return out2d.reshape(x.shape)


def _tiled_path_ok(x, block_rows) -> bool:
    """Use the tiled kernel only when it is strictly free to do so:
    last dim already lane-dense (no relayout on reshape), rows a whole
    multiple of the tile, and >= 2 grid steps so both v7x cores get work."""
    if x.ndim < 2 or x.shape[-1] != _LANE:
        return False
    rows = x.size // _LANE
    return rows % block_rows == 0 and (rows // block_rows) >= 2


# ---------------------------------------------------------------------------
# Forward
# ---------------------------------------------------------------------------
def bbox_decoder_forward(x, *, force_pallas_copy=False):
    """Forward pass of BBoxDecoderModel (identity).

    Default: return x directly -- no kernel launch, no HBM round trip.
    force_pallas_copy=True runs an explicit Pallas copy kernel instead.
    """
    if not force_pallas_copy:
        return x
    if _tiled_path_ok(x, _BLOCK_ROWS):
        return _tiled_identity_copy(x, block_rows=_BLOCK_ROWS)
    return _dma_identity_copy(x)


# ---------------------------------------------------------------------------
# Module port
# ---------------------------------------------------------------------------
class BBoxAEModelConfig:
    model_type = "BBoxAEModel"

    def __init__(self, bbox_type: str = "xyxy"):
        self.n_points = len(bbox_type)


class BBoxDecoderModel:
    """JAX/Pallas port. The PyTorch module defines no parameters."""

    def __init__(self, config: BBoxAEModelConfig):
        self.config = config
        # TODO(synk): module defines no weights; nothing to initialize.

    def __call__(self, x):
        # Production path: identity with zero kernel overhead.
        return bbox_decoder_forward(x)


if __name__ == "__main__":
    key = jax.random.PRNGKey(0)
    cfg = BBoxAEModelConfig(bbox_type="xyxy")  # n_points = 4
    batch, seq = 2, 8
    x = jax.random.uniform(key, (batch, seq, cfg.n_points), dtype=jnp.float32)

    model = BBoxDecoderModel(cfg)

    # Production path: identity, no kernel.
    y_fast = model(x)

    # Forced Pallas path on the bbox-sized tensor: direct HBM->HBM DMA copy.
    y_dma = jax.block_until_ready(bbox_decoder_forward(x, force_pallas_copy=True))

    # Forced Pallas path on a lane-dense slab: tiled, pipelined VMEM copy
    # ((2, 1024, 1024) f32 -> 2048 rows -> >=2 tiles on every chip).
    x_big = jax.random.uniform(
        jax.random.PRNGKey(1), (2, 1024, _LANE), dtype=jnp.float32
    )
    y_big = jax.block_until_ready(bbox_decoder_forward(x_big, force_pallas_copy=True))

    assert y_fast.shape == x.shape and y_fast.dtype == x.dtype
    assert bool(jnp.all(y_fast == x))
    assert y_dma.shape == x.shape and y_dma.dtype == x.dtype
    assert bool(jnp.all(y_dma == x))
    assert y_big.shape == x_big.shape and y_big.dtype == x_big.dtype
    assert bool(jnp.all(y_big == x_big))
    print("KERNEL_OK")
</pallas_src>

<mosaic_0001>
module attributes {stable_mosaic.version = 11 : i64} {
  func.func @_dma_copy_kernel(%arg0: memref<2x8x4xf32, #tpu.memory_space<any>>, %arg1: memref<2x8x4xf32, #tpu.memory_space<any>>, %arg2: memref<!tpu.dma_semaphore, #tpu.memory_space<semaphore_mem>>) attributes {dimension_semantics = [], scalar_prefetch = 0 : i64, scratch_operands = 1 : i64, tpu.core_type = #tpu.core_type<tc>} {
    tpu.enqueue_dma source(%arg0 : memref<2x8x4xf32, #tpu.memory_space<any>>) target(%arg1 : memref<2x8x4xf32, #tpu.memory_space<any>>) target_semaphore(%arg2 : memref<!tpu.dma_semaphore, #tpu.memory_space<semaphore_mem>>)
    tpu.wait_dma2 semaphore(%arg2 : memref<!tpu.dma_semaphore, #tpu.memory_space<semaphore_mem>>) src(%arg0 : memref<2x8x4xf32, #tpu.memory_space<any>>) dst(%arg1 : memref<2x8x4xf32, #tpu.memory_space<any>>)
    return
  }
}

</mosaic_0001>

<bundles_post_ra>
// kernel: _dma_identity_copy.1
= control target key start
LH: loop header
LB: loop body
LE: loop exit
PB: predicated region body
PF: predicated region fallthrough
CT: control target
= control target key end

     0   :  { %s93_s0 = inlined_call_operand.vmem [shape: f32[2,8,4], index: 0, kind: input, shape index: {}]   ;;  %s94_s1 = inlined_call_operand.vmem [shape: f32[2,8,4], index: 1, kind: output, shape index: {}]  }
   0x1   :  { %v38_v0 = vld [vmem:[%s93_s0] sm:$0xff]  ;;  %v40_v1 = vld [vmem:[%s93_s0 + $0x8] sm:$0xff] }
   0x2   :  { %39 = vst [vmem:[%s94_s1] sm:$0xff] %v38_v0  ;;  %41 = vst [vmem:[%s94_s1 + $0x8] sm:$0xff] %v40_v1 }
   0x3   :  { %49 = vsyncadd [#allocation2], 256 }
   0x4   :  { %69 = dma.done.wait [#allocation2], 256 }
   0x5   :  { %70 = vsyncadd [#allocation2], 4294967040 }
   0x6   :  { %54 = vsyncmov [#allocation2] }
   0x9   :  { %s55_s14 = vpop.sfrf %54 }
   0xa   :  { %p68_p0 = scmp.ne.s32.totalorder %s55_s14, 0 }
   0xc   :  { %59 = shalt.err (%p68_p0)  }

</bundles_post_ra>
